<compile_context>
chip_gen: v5e
topology: v5e:2x2
jax: 0.10.0
libtpu: 0.0.40
codegen_flags: <defaults>
</compile_context>

<pallas_src>
import functools
import math

import jax
import jax.numpy as jnp
from jax.experimental import pallas as pl
from jax.experimental.pallas import tpu as pltpu


def _make_lstm_kernel(seq_len: int, nb: int):
    """Build the LSTM kernel for `nb` independent sequences of length `seq_len`."""

    def kernel(x_ref, wih_t_ref, whh_t_ref, bias_ref, out_ref):
        # x_ref:     (1, seq_len*nb, I)  bf16, time-major within the block
        #            (row t*nb + n == sequence n, timestep t)
        # wih_t_ref: (I, 4H)  bf16   W_ih^T
        # whh_t_ref: (H, 4H)  bf16   W_hh^T
        # bias_ref:  (1, 4H)  f32    b_ih + b_hh
        # out_ref:   (1, seq_len*nb, H)  f32
        H = out_ref.shape[-1]

        # One batched input projection for all sequences & timesteps on the MXU
        # (bf16 operands, f32 accumulation), bias folded in.
        xproj = (
            jnp.dot(x_ref[0], wih_t_ref[...], preferred_element_type=jnp.float32)
            + bias_ref[...]
        )  # (seq_len*nb, 4H) f32

        whh_t = whh_t_ref[...]  # (H, 4H) bf16, loop-invariant
        # TODO(synk): on v7x, consider pltpu.matmul_push_rhs/matmul_acc_lhs/
        # matmul_pop to latch whh_t in the MXU across the unrolled steps and
        # accumulate xproj[t] in the MRB; relying on Mosaic to hoist the
        # repeated identical RHS push for now.

        # Zero initial states (module resets states outside training).
        h = jnp.zeros((nb, H), jnp.float32)
        c = jnp.zeros((nb, H), jnp.float32)

        # seq_len is a trace-time constant: fully unroll so the serial h/c chain
        # lives in vregs and the scheduler sees across timesteps.
        for t in range(seq_len):
            gates = xproj[t * nb:(t + 1) * nb, :] + jnp.dot(
                h.astype(jnp.bfloat16), whh_t, preferred_element_type=jnp.float32
            )  # (nb, 4H) f32

            # Two full-row EUP passes, then static lane slices (i, f, g, o).
            sig = jax.nn.sigmoid(gates)
            tnh = jnp.tanh(gates)
            i_g = sig[:, 0 * H:1 * H]
            f_g = sig[:, 1 * H:2 * H]
            g_g = tnh[:, 2 * H:3 * H]
            o_g = sig[:, 3 * H:4 * H]

            c = f_g * c + i_g * g_g
            h = o_g * jnp.tanh(c)

            # Per-step static-slice store (no concat epilogue); overlaps the
            # next step's matmul on the vst slot.
            out_ref[0, t * nb:(t + 1) * nb, :] = h
            # TODO(synk): lane-dense (multiple-of-128) output packing would need
            # a per-step (nb,H)->(1,nb*H) relayout on the serial chain; skipped.

    return kernel


def prepare_lstm_weights(weight_ih, weight_hh, bias_ih, bias_hh):
    """One-time weight preprocessing, hoisted out of the per-call path.

    Args:
      weight_ih: (4H, I), weight_hh: (4H, H), bias_ih/bias_hh: (4H,)
    Returns:
      (wih_t, whh_t, bias): pre-transposed bf16 MXU operands and fused f32 bias.
    """
    wih_t = weight_ih.T.astype(jnp.bfloat16)                         # (I, 4H)
    whh_t = weight_hh.T.astype(jnp.bfloat16)                         # (H, 4H)
    bias = (bias_ih.astype(jnp.float32)
            + bias_hh.astype(jnp.float32)).reshape(1, -1)            # (1, 4H)
    return wih_t, whh_t, bias


@functools.partial(jax.jit, static_argnames=("nb",))
def meta_lstm_forward_batched(x, wih_t, whh_t, bias, *, nb=4):
    """N independent MetaLSTMLayer forwards (zero initial state each) in one call.

    Args:
      x: (N, S, I) f32 — N independent sequences.
      wih_t/whh_t/bias: from prepare_lstm_weights.
      nb: sequences stacked along the matmul M dim per grid step (N % nb == 0).
    Returns:
      (N, S, H) f32 hidden states (per-sequence LSTM output).
    """
    N, S, I = x.shape
    H4 = wih_t.shape[1]
    H = H4 // 4
    assert N % nb == 0, "N must be a multiple of nb"
    nblk = N // nb

    # Time-major within each block so per-step gate slabs are static sublane
    # slices: row (t*nb + n) of a block holds sequence n at timestep t.
    xb = (x.astype(jnp.bfloat16)
            .reshape(nblk, nb, S, I)
            .transpose(0, 2, 1, 3)
            .reshape(nblk, S * nb, I))

    out = pl.pallas_call(
        _make_lstm_kernel(S, nb),
        out_shape=jax.ShapeDtypeStruct((nblk, S * nb, H), jnp.float32),
        grid=(nblk,),
        in_specs=[
            pl.BlockSpec((1, S * nb, I), lambda b: (b, 0, 0)),
            pl.BlockSpec((wih_t.shape[0], H4), lambda b: (0, 0)),
            pl.BlockSpec((H, H4), lambda b: (0, 0)),
            pl.BlockSpec((1, H4), lambda b: (0, 0)),
        ],
        out_specs=pl.BlockSpec((1, S * nb, H), lambda b: (b, 0, 0)),
        compiler_params=pltpu.CompilerParams(
            dimension_semantics=("parallel",)),
    )(xb, wih_t, whh_t, bias)

    # (nblk, S, nb, H) -> (N, S, H)
    return out.reshape(nblk, S, nb, H).transpose(0, 2, 1, 3).reshape(N, S, H)


def meta_lstm_forward(x, weight_ih, weight_hh, bias_ih, bias_hh):
    """MetaLSTMLayer.forward equivalent (eval / reset-state path), batch 1.

    x: (1, S, I) -> (S, H) == output.view(-1, hidden_units).
    """
    assert x.shape[0] == 1, "MetaLSTMLayer's stored (1,1,H) states imply batch 1"
    # TODO(synk): the training-mode stateful carry of h_n/c_n across forward
    # calls is host-side module state; only the reset-state path is kernelized.
    wih_t, whh_t, bias = prepare_lstm_weights(weight_ih, weight_hh, bias_ih, bias_hh)
    out = meta_lstm_forward_batched(x, wih_t, whh_t, bias, nb=1)
    return out.reshape(x.shape[1], -1)


def _reference_lstm_batched(x, weight_ih, weight_hh, bias_ih, bias_hh):
    """Pure-JAX f32 reference (PyTorch _VF.lstm semantics, zero initial state)."""
    N, S, I = x.shape
    H = weight_hh.shape[1]
    h = jnp.zeros((N, H), jnp.float32)
    c = jnp.zeros((N, H), jnp.float32)
    outs = []
    for t in range(S):
        gates = (x[:, t, :] @ weight_ih.T + bias_ih + h @ weight_hh.T + bias_hh)
        i_g = jax.nn.sigmoid(gates[:, 0 * H:1 * H])
        f_g = jax.nn.sigmoid(gates[:, 1 * H:2 * H])
        g_g = jnp.tanh(gates[:, 2 * H:3 * H])
        o_g = jax.nn.sigmoid(gates[:, 3 * H:4 * H])
        c = f_g * c + i_g * g_g
        h = o_g * jnp.tanh(c)
        outs.append(h)
    return jnp.stack(outs, axis=1)  # (N, S, H)


if __name__ == "__main__":
    # Shapes consistent with the module: seq=8, input_shape=16, hidden_units=32.
    # 8 independent sequences, 4 per grid step -> 2 "parallel" grid steps.
    seq, input_shape, hidden_units = 8, 16, 32
    n_seq, nb = 8, 4

    key = jax.random.PRNGKey(0)
    kx, k1, k2, k3, k4 = jax.random.split(key, 5)

    stdv = 1.0 / math.sqrt(hidden_units)
    weight_ih = jax.random.uniform(
        k1, (4 * hidden_units, input_shape), jnp.float32, -stdv, stdv)
    weight_hh = jax.random.uniform(
        k2, (4 * hidden_units, hidden_units), jnp.float32, -stdv, stdv)
    bias_ih = jax.random.uniform(
        k3, (4 * hidden_units,), jnp.float32, -stdv, stdv)
    bias_hh = jax.random.uniform(
        k4, (4 * hidden_units,), jnp.float32, -stdv, stdv)

    x = jax.random.normal(kx, (n_seq, seq, input_shape), jnp.float32)

    # Preprocess weights once (hoisted out of the per-call path).
    wih_t, whh_t, bias = prepare_lstm_weights(weight_ih, weight_hh, bias_ih, bias_hh)

    # Batched path: all sequences in one pallas_call, parallel grid.
    out = meta_lstm_forward_batched(x, wih_t, whh_t, bias, nb=nb)
    out = jax.block_until_ready(out)

    ref = _reference_lstm_batched(x, weight_ih, weight_hh, bias_ih, bias_hh)
    assert out.shape == (n_seq, seq, hidden_units)
    # bf16 MXU operands (f32 accumulation): relaxed tolerance vs f32 reference.
    assert jnp.allclose(out, ref, atol=3e-2, rtol=3e-2), "batched mismatch vs reference"

    # Module-semantics path (batch 1, reset states), as MetaLSTMLayer.forward.
    out1 = meta_lstm_forward(x[:1], weight_ih, weight_hh, bias_ih, bias_hh)
    out1 = jax.block_until_ready(out1)
    assert out1.shape == (seq, hidden_units)
    assert jnp.allclose(out1, ref[0], atol=3e-2, rtol=3e-2), "single-seq mismatch vs reference"

    print("KERNEL_OK")
</pallas_src>

<mosaic_0001>
module attributes {stable_mosaic.version = 11 : i64} {
  func.func @kernel(%arg0: i32, %arg1: memref<1x32x16xbf16, #tpu.memory_space<vmem>>, %arg2: memref<16x128xbf16, #tpu.memory_space<vmem>>, %arg3: memref<32x128xbf16, #tpu.memory_space<vmem>>, %arg4: memref<1x128xf32, #tpu.memory_space<vmem>>, %arg5: memref<1x32x32xf32, #tpu.memory_space<vmem>>) attributes {dimension_semantics = [#tpu.dimension_semantics<parallel>], iteration_bounds = array<i64: 2>, scalar_prefetch = 0 : i64, scratch_operands = 0 : i64, tpu.core_type = #tpu.core_type<tc>, window_params = [{transform_indices = @transform_0, window_bounds = array<i64: 1, 32, 16>}, {pipeline_mode = #tpu.pipeline_mode<synchronous>, transform_indices = @transform_1, window_bounds = array<i64: 16, 128>}, {pipeline_mode = #tpu.pipeline_mode<synchronous>, transform_indices = @transform_2, window_bounds = array<i64: 32, 128>}, {pipeline_mode = #tpu.pipeline_mode<synchronous>, transform_indices = @transform_3, window_bounds = array<i64: 1, 128>}, {transform_indices = @transform_4, window_bounds = array<i64: 1, 32, 32>}]} {
    %c0 = arith.constant 0 : index
    %c0_0 = arith.constant 0 : index
    %c0_1 = arith.constant 0 : index
    %0 = vector.load %arg1[%c0, %c0_0, %c0_1] : memref<1x32x16xbf16, #tpu.memory_space<vmem>>, vector<1x32x16xbf16>
    %1 = vector.shape_cast %0 : vector<1x32x16xbf16> to vector<32x16xbf16>
    %c0_2 = arith.constant 0 : index
    %c0_3 = arith.constant 0 : index
    %2 = vector.load %arg2[%c0_2, %c0_3] : memref<16x128xbf16, #tpu.memory_space<vmem>>, vector<16x128xbf16>
    %cst = arith.constant dense<0.000000e+00> : vector<32x128xf32>
    %3 = tpu.matmul %1, %2, %cst {dimension_numbers = #tpu.dot_dimension_numbers<[1], [0], [0], [1], [0, 0, 1, 1], [], []>} : vector<32x16xbf16>, vector<16x128xbf16>, vector<32x128xf32> -> vector<32x128xf32>
    %c0_4 = arith.constant 0 : index
    %c0_5 = arith.constant 0 : index
    %4 = vector.load %arg4[%c0_4, %c0_5] : memref<1x128xf32, #tpu.memory_space<vmem>>, vector<1x128xf32>
    %5 = vector.broadcast %4 : vector<1x128xf32> to vector<32x128xf32>
    %6 = arith.addf %3, %5 : vector<32x128xf32>
    %c0_6 = arith.constant 0 : index
    %c0_7 = arith.constant 0 : index
    %7 = vector.load %arg3[%c0_6, %c0_7] : memref<32x128xbf16, #tpu.memory_space<vmem>>, vector<32x128xbf16>
    %cst_8 = arith.constant 0.000000e+00 : f32
    %8 = vector.broadcast %cst_8 : f32 to vector<4x32xf32>
    %cst_9 = arith.constant 0.000000e+00 : f32
    %9 = vector.broadcast %cst_9 : f32 to vector<4x32xf32>
    %10 = vector.extract_strided_slice %6 {offsets = [0, 0], sizes = [4, 128], strides = [1, 1]} : vector<32x128xf32> to vector<4x128xf32>
    %11 = arith.truncf %8 : vector<4x32xf32> to vector<4x32xbf16>
    %cst_10 = arith.constant dense<0.000000e+00> : vector<4x128xf32>
    %12 = tpu.matmul %11, %7, %cst_10 {dimension_numbers = #tpu.dot_dimension_numbers<[1], [0], [0], [1], [0, 0, 1, 1], [], []>} : vector<4x32xbf16>, vector<32x128xbf16>, vector<4x128xf32> -> vector<4x128xf32>
    %13 = arith.addf %10, %12 : vector<4x128xf32>
    %14 = arith.negf %13 : vector<4x128xf32>
    %15 = math.exp %14 : vector<4x128xf32>
    %cst_11 = arith.constant 1.000000e+00 : f32
    %16 = vector.broadcast %cst_11 : f32 to vector<4x128xf32>
    %17 = arith.addf %16, %15 : vector<4x128xf32>
    %18 = arith.divf %16, %17 : vector<4x128xf32>
    %19 = math.tanh %13 : vector<4x128xf32>
    %20 = vector.extract_strided_slice %18 {offsets = [0, 0], sizes = [4, 32], strides = [1, 1]} : vector<4x128xf32> to vector<4x32xf32>
    %21 = vector.extract_strided_slice %18 {offsets = [0, 32], sizes = [4, 32], strides = [1, 1]} : vector<4x128xf32> to vector<4x32xf32>
    %22 = vector.extract_strided_slice %19 {offsets = [0, 64], sizes = [4, 32], strides = [1, 1]} : vector<4x128xf32> to vector<4x32xf32>
    %23 = vector.extract_strided_slice %18 {offsets = [0, 96], sizes = [4, 32], strides = [1, 1]} : vector<4x128xf32> to vector<4x32xf32>
    %24 = arith.mulf %21, %9 : vector<4x32xf32>
    %25 = arith.mulf %20, %22 : vector<4x32xf32>
    %26 = arith.addf %24, %25 : vector<4x32xf32>
    %27 = math.tanh %26 : vector<4x32xf32>
    %28 = arith.mulf %23, %27 : vector<4x32xf32>
    %c0_12 = arith.constant 0 : index
    %c0_13 = arith.constant 0 : index
    %c0_14 = arith.constant 0 : index
    %29 = vector.load %arg5[%c0_12, %c0_13, %c0_14] : memref<1x32x32xf32, #tpu.memory_space<vmem>>, vector<1x4x32xf32>
    %30 = vector.shape_cast %29 : vector<1x4x32xf32> to vector<4x32xf32>
    %31 = vector.shape_cast %28 : vector<4x32xf32> to vector<1x4x32xf32>
    tpu.vector_store %arg5[%c0_12, %c0_13, %c0_14], %31 {strides = array<i32>} : memref<1x32x32xf32, #tpu.memory_space<vmem>>, vector<1x4x32xf32>,
    %32 = vector.extract_strided_slice %6 {offsets = [4, 0], sizes = [4, 128], strides = [1, 1]} : vector<32x128xf32> to vector<4x128xf32>
    %33 = arith.truncf %28 : vector<4x32xf32> to vector<4x32xbf16>
    %cst_15 = arith.constant dense<0.000000e+00> : vector<4x128xf32>
    %34 = tpu.matmul %33, %7, %cst_15 {dimension_numbers = #tpu.dot_dimension_numbers<[1], [0], [0], [1], [0, 0, 1, 1], [], []>} : vector<4x32xbf16>, vector<32x128xbf16>, vector<4x128xf32> -> vector<4x128xf32>
    %35 = arith.addf %32, %34 : vector<4x128xf32>
    %36 = arith.negf %35 : vector<4x128xf32>
    %37 = math.exp %36 : vector<4x128xf32>
    %cst_16 = arith.constant 1.000000e+00 : f32
    %38 = vector.broadcast %cst_16 : f32 to vector<4x128xf32>
    %39 = arith.addf %38, %37 : vector<4x128xf32>
    %40 = arith.divf %38, %39 : vector<4x128xf32>
    %41 = math.tanh %35 : vector<4x128xf32>
    %42 = vector.extract_strided_slice %40 {offsets = [0, 0], sizes = [4, 32], strides = [1, 1]} : vector<4x128xf32> to vector<4x32xf32>
    %43 = vector.extract_strided_slice %40 {offsets = [0, 32], sizes = [4, 32], strides = [1, 1]} : vector<4x128xf32> to vector<4x32xf32>
    %44 = vector.extract_strided_slice %41 {offsets = [0, 64], sizes = [4, 32], strides = [1, 1]} : vector<4x128xf32> to vector<4x32xf32>
    %45 = vector.extract_strided_slice %40 {offsets = [0, 96], sizes = [4, 32], strides = [1, 1]} : vector<4x128xf32> to vector<4x32xf32>
    %46 = arith.mulf %43, %26 : vector<4x32xf32>
    %47 = arith.mulf %42, %44 : vector<4x32xf32>
    %48 = arith.addf %46, %47 : vector<4x32xf32>
    %49 = math.tanh %48 : vector<4x32xf32>
    %50 = arith.mulf %45, %49 : vector<4x32xf32>
    %c0_17 = arith.constant 0 : index
    %c4 = arith.constant 4 : index
    %c0_18 = arith.constant 0 : index
    %51 = vector.load %arg5[%c0_17, %c4, %c0_18] : memref<1x32x32xf32, #tpu.memory_space<vmem>>, vector<1x4x32xf32>
    %52 = vector.shape_cast %51 : vector<1x4x32xf32> to vector<4x32xf32>
    %53 = vector.shape_cast %50 : vector<4x32xf32> to vector<1x4x32xf32>
    tpu.vector_store %arg5[%c0_17, %c4, %c0_18], %53 {strides = array<i32>} : memref<1x32x32xf32, #tpu.memory_space<vmem>>, vector<1x4x32xf32>,
    %54 = vector.extract_strided_slice %6 {offsets = [8, 0], sizes = [4, 128], strides = [1, 1]} : vector<32x128xf32> to vector<4x128xf32>
    %55 = arith.truncf %50 : vector<4x32xf32> to vector<4x32xbf16>
    %cst_19 = arith.constant dense<0.000000e+00> : vector<4x128xf32>
    %56 = tpu.matmul %55, %7, %cst_19 {dimension_numbers = #tpu.dot_dimension_numbers<[1], [0], [0], [1], [0, 0, 1, 1], [], []>} : vector<4x32xbf16>, vector<32x128xbf16>, vector<4x128xf32> -> vector<4x128xf32>
    %57 = arith.addf %54, %56 : vector<4x128xf32>
    %58 = arith.negf %57 : vector<4x128xf32>
    %59 = math.exp %58 : vector<4x128xf32>
    %cst_20 = arith.constant 1.000000e+00 : f32
    %60 = vector.broadcast %cst_20 : f32 to vector<4x128xf32>
    %61 = arith.addf %60, %59 : vector<4x128xf32>
    %62 = arith.divf %60, %61 : vector<4x128xf32>
    %63 = math.tanh %57 : vector<4x128xf32>
    %64 = vector.extract_strided_slice %62 {offsets = [0, 0], sizes = [4, 32], strides = [1, 1]} : vector<4x128xf32> to vector<4x32xf32>
    %65 = vector.extract_strided_slice %62 {offsets = [0, 32], sizes = [4, 32], strides = [1, 1]} : vector<4x128xf32> to vector<4x32xf32>
    %66 = vector.extract_strided_slice %63 {offsets = [0, 64], sizes = [4, 32], strides = [1, 1]} : vector<4x128xf32> to vector<4x32xf32>
    %67 = vector.extract_strided_slice %62 {offsets = [0, 96], sizes = [4, 32], strides = [1, 1]} : vector<4x128xf32> to vector<4x32xf32>
    %68 = arith.mulf %65, %48 : vector<4x32xf32>
    %69 = arith.mulf %64, %66 : vector<4x32xf32>
    %70 = arith.addf %68, %69 : vector<4x32xf32>
    %71 = math.tanh %70 : vector<4x32xf32>
    %72 = arith.mulf %67, %71 : vector<4x32xf32>
    %c0_21 = arith.constant 0 : index
    %c8 = arith.constant 8 : index
    %c0_22 = arith.constant 0 : index
    %73 = vector.load %arg5[%c0_21, %c8, %c0_22] : memref<1x32x32xf32, #tpu.memory_space<vmem>>, vector<1x4x32xf32>
    %74 = vector.shape_cast %73 : vector<1x4x32xf32> to vector<4x32xf32>
    %75 = vector.shape_cast %72 : vector<4x32xf32> to vector<1x4x32xf32>
    tpu.vector_store %arg5[%c0_21, %c8, %c0_22], %75 {strides = array<i32>} : memref<1x32x32xf32, #tpu.memory_space<vmem>>, vector<1x4x32xf32>,
    %76 = vector.extract_strided_slice %6 {offsets = [12, 0], sizes = [4, 128], strides = [1, 1]} : vector<32x128xf32> to vector<4x128xf32>
    %77 = arith.truncf %72 : vector<4x32xf32> to vector<4x32xbf16>
    %cst_23 = arith.constant dense<0.000000e+00> : vector<4x128xf32>
    %78 = tpu.matmul %77, %7, %cst_23 {dimension_numbers = #tpu.dot_dimension_numbers<[1], [0], [0], [1], [0, 0, 1, 1], [], []>} : vector<4x32xbf16>, vector<32x128xbf16>, vector<4x128xf32> -> vector<4x128xf32>
    %79 = arith.addf %76, %78 : vector<4x128xf32>
    %80 = arith.negf %79 : vector<4x128xf32>
    %81 = math.exp %80 : vector<4x128xf32>
    %cst_24 = arith.constant 1.000000e+00 : f32
    %82 = vector.broadcast %cst_24 : f32 to vector<4x128xf32>
    %83 = arith.addf %82, %81 : vector<4x128xf32>
    %84 = arith.divf %82, %83 : vector<4x128xf32>
    %85 = math.tanh %79 : vector<4x128xf32>
    %86 = vector.extract_strided_slice %84 {offsets = [0, 0], sizes = [4, 32], strides = [1, 1]} : vector<4x128xf32> to vector<4x32xf32>
    %87 = vector.extract_strided_slice %84 {offsets = [0, 32], sizes = [4, 32], strides = [1, 1]} : vector<4x128xf32> to vector<4x32xf32>
    %88 = vector.extract_strided_slice %85 {offsets = [0, 64], sizes = [4, 32], strides = [1, 1]} : vector<4x128xf32> to vector<4x32xf32>
    %89 = vector.extract_strided_slice %84 {offsets = [0, 96], sizes = [4, 32], strides = [1, 1]} : vector<4x128xf32> to vector<4x32xf32>
    %90 = arith.mulf %87, %70 : vector<4x32xf32>
    %91 = arith.mulf %86, %88 : vector<4x32xf32>
    %92 = arith.addf %90, %91 : vector<4x32xf32>
    %93 = math.tanh %92 : vector<4x32xf32>
    %94 = arith.mulf %89, %93 : vector<4x32xf32>
    %c0_25 = arith.constant 0 : index
    %c12 = arith.constant 12 : index
    %c0_26 = arith.constant 0 : index
    %95 = vector.load %arg5[%c0_25, %c12, %c0_26] : memref<1x32x32xf32, #tpu.memory_space<vmem>>, vector<1x4x32xf32>
    %96 = vector.shape_cast %95 : vector<1x4x32xf32> to vector<4x32xf32>
    %97 = vector.shape_cast %94 : vector<4x32xf32> to vector<1x4x32xf32>
    tpu.vector_store %arg5[%c0_25, %c12, %c0_26], %97 {strides = array<i32>} : memref<1x32x32xf32, #tpu.memory_space<vmem>>, vector<1x4x32xf32>,
    %98 = vector.extract_strided_slice %6 {offsets = [16, 0], sizes = [4, 128], strides = [1, 1]} : vector<32x128xf32> to vector<4x128xf32>
    %99 = arith.truncf %94 : vector<4x32xf32> to vector<4x32xbf16>
    %cst_27 = arith.constant dense<0.000000e+00> : vector<4x128xf32>
    %100 = tpu.matmul %99, %7, %cst_27 {dimension_numbers = #tpu.dot_dimension_numbers<[1], [0], [0], [1], [0, 0, 1, 1], [], []>} : vector<4x32xbf16>, vector<32x128xbf16>, vector<4x128xf32> -> vector<4x128xf32>
    %101 = arith.addf %98, %100 : vector<4x128xf32>
    %102 = arith.negf %101 : vector<4x128xf32>
    %103 = math.exp %102 : vector<4x128xf32>
    %cst_28 = arith.constant 1.000000e+00 : f32
    %104 = vector.broadcast %cst_28 : f32 to vector<4x128xf32>
    %105 = arith.addf %104, %103 : vector<4x128xf32>
    %106 = arith.divf %104, %105 : vector<4x128xf32>
    %107 = math.tanh %101 : vector<4x128xf32>
    %108 = vector.extract_strided_slice %106 {offsets = [0, 0], sizes = [4, 32], strides = [1, 1]} : vector<4x128xf32> to vector<4x32xf32>
    %109 = vector.extract_strided_slice %106 {offsets = [0, 32], sizes = [4, 32], strides = [1, 1]} : vector<4x128xf32> to vector<4x32xf32>
    %110 = vector.extract_strided_slice %107 {offsets = [0, 64], sizes = [4, 32], strides = [1, 1]} : vector<4x128xf32> to vector<4x32xf32>
    %111 = vector.extract_strided_slice %106 {offsets = [0, 96], sizes = [4, 32], strides = [1, 1]} : vector<4x128xf32> to vector<4x32xf32>
    %112 = arith.mulf %109, %92 : vector<4x32xf32>
    %113 = arith.mulf %108, %110 : vector<4x32xf32>
    %114 = arith.addf %112, %113 : vector<4x32xf32>
    %115 = math.tanh %114 : vector<4x32xf32>
    %116 = arith.mulf %111, %115 : vector<4x32xf32>
    %c0_29 = arith.constant 0 : index
    %c16 = arith.constant 16 : index
    %c0_30 = arith.constant 0 : index
    %117 = vector.load %arg5[%c0_29, %c16, %c0_30] : memref<1x32x32xf32, #tpu.memory_space<vmem>>, vector<1x4x32xf32>
    %118 = vector.shape_cast %117 : vector<1x4x32xf32> to vector<4x32xf32>
    %119 = vector.shape_cast %116 : vector<4x32xf32> to vector<1x4x32xf32>
    tpu.vector_store %arg5[%c0_29, %c16, %c0_30], %119 {strides = array<i32>} : memref<1x32x32xf32, #tpu.memory_space<vmem>>, vector<1x4x32xf32>,
    %120 = vector.extract_strided_slice %6 {offsets = [20, 0], sizes = [4, 128], strides = [1, 1]} : vector<32x128xf32> to vector<4x128xf32>
    %121 = arith.truncf %116 : vector<4x32xf32> to vector<4x32xbf16>
    %cst_31 = arith.constant dense<0.000000e+00> : vector<4x128xf32>
    %122 = tpu.matmul %121, %7, %cst_31 {dimension_numbers = #tpu.dot_dimension_numbers<[1], [0], [0], [1], [0, 0, 1, 1], [], []>} : vector<4x32xbf16>, vector<32x128xbf16>, vector<4x128xf32> -> vector<4x128xf32>
    %123 = arith.addf %120, %122 : vector<4x128xf32>
    %124 = arith.negf %123 : vector<4x128xf32>
    %125 = math.exp %124 : vector<4x128xf32>
    %cst_32 = arith.constant 1.000000e+00 : f32
    %126 = vector.broadcast %cst_32 : f32 to vector<4x128xf32>
    %127 = arith.addf %126, %125 : vector<4x128xf32>
    %128 = arith.divf %126, %127 : vector<4x128xf32>
    %129 = math.tanh %123 : vector<4x128xf32>
    %130 = vector.extract_strided_slice %128 {offsets = [0, 0], sizes = [4, 32], strides = [1, 1]} : vector<4x128xf32> to vector<4x32xf32>
    %131 = vector.extract_strided_slice %128 {offsets = [0, 32], sizes = [4, 32], strides = [1, 1]} : vector<4x128xf32> to vector<4x32xf32>
    %132 = vector.extract_strided_slice %129 {offsets = [0, 64], sizes = [4, 32], strides = [1, 1]} : vector<4x128xf32> to vector<4x32xf32>
    %133 = vector.extract_strided_slice %128 {offsets = [0, 96], sizes = [4, 32], strides = [1, 1]} : vector<4x128xf32> to vector<4x32xf32>
    %134 = arith.mulf %131, %114 : vector<4x32xf32>
    %135 = arith.mulf %130, %132 : vector<4x32xf32>
    %136 = arith.addf %134, %135 : vector<4x32xf32>
    %137 = math.tanh %136 : vector<4x32xf32>
    %138 = arith.mulf %133, %137 : vector<4x32xf32>
    %c0_33 = arith.constant 0 : index
    %c20 = arith.constant 20 : index
    %c0_34 = arith.constant 0 : index
    %139 = vector.load %arg5[%c0_33, %c20, %c0_34] : memref<1x32x32xf32, #tpu.memory_space<vmem>>, vector<1x4x32xf32>
    %140 = vector.shape_cast %139 : vector<1x4x32xf32> to vector<4x32xf32>
    %141 = vector.shape_cast %138 : vector<4x32xf32> to vector<1x4x32xf32>
    tpu.vector_store %arg5[%c0_33, %c20, %c0_34], %141 {strides = array<i32>} : memref<1x32x32xf32, #tpu.memory_space<vmem>>, vector<1x4x32xf32>,
    %142 = vector.extract_strided_slice %6 {offsets = [24, 0], sizes = [4, 128], strides = [1, 1]} : vector<32x128xf32> to vector<4x128xf32>
    %143 = arith.truncf %138 : vector<4x32xf32> to vector<4x32xbf16>
    %cst_35 = arith.constant dense<0.000000e+00> : vector<4x128xf32>
    %144 = tpu.matmul %143, %7, %cst_35 {dimension_numbers = #tpu.dot_dimension_numbers<[1], [0], [0], [1], [0, 0, 1, 1], [], []>} : vector<4x32xbf16>, vector<32x128xbf16>, vector<4x128xf32> -> vector<4x128xf32>
    %145 = arith.addf %142, %144 : vector<4x128xf32>
    %146 = arith.negf %145 : vector<4x128xf32>
    %147 = math.exp %146 : vector<4x128xf32>
    %cst_36 = arith.constant 1.000000e+00 : f32
    %148 = vector.broadcast %cst_36 : f32 to vector<4x128xf32>
    %149 = arith.addf %148, %147 : vector<4x128xf32>
    %150 = arith.divf %148, %149 : vector<4x128xf32>
    %151 = math.tanh %145 : vector<4x128xf32>
    %152 = vector.extract_strided_slice %150 {offsets = [0, 0], sizes = [4, 32], strides = [1, 1]} : vector<4x128xf32> to vector<4x32xf32>
    %153 = vector.extract_strided_slice %150 {offsets = [0, 32], sizes = [4, 32], strides = [1, 1]} : vector<4x128xf32> to vector<4x32xf32>
    %154 = vector.extract_strided_slice %151 {offsets = [0, 64], sizes = [4, 32], strides = [1, 1]} : vector<4x128xf32> to vector<4x32xf32>
    %155 = vector.extract_strided_slice %150 {offsets = [0, 96], sizes = [4, 32], strides = [1, 1]} : vector<4x128xf32> to vector<4x32xf32>
    %156 = arith.mulf %153, %136 : vector<4x32xf32>
    %157 = arith.mulf %152, %154 : vector<4x32xf32>
    %158 = arith.addf %156, %157 : vector<4x32xf32>
    %159 = math.tanh %158 : vector<4x32xf32>
    %160 = arith.mulf %155, %159 : vector<4x32xf32>
    %c0_37 = arith.constant 0 : index
    %c24 = arith.constant 24 : index
    %c0_38 = arith.constant 0 : index
    %161 = vector.load %arg5[%c0_37, %c24, %c0_38] : memref<1x32x32xf32, #tpu.memory_space<vmem>>, vector<1x4x32xf32>
    %162 = vector.shape_cast %161 : vector<1x4x32xf32> to vector<4x32xf32>
    %163 = vector.shape_cast %160 : vector<4x32xf32> to vector<1x4x32xf32>
    tpu.vector_store %arg5[%c0_37, %c24, %c0_38], %163 {strides = array<i32>} : memref<1x32x32xf32, #tpu.memory_space<vmem>>, vector<1x4x32xf32>,
    %164 = vector.extract_strided_slice %6 {offsets = [28, 0], sizes = [4, 128], strides = [1, 1]} : vector<32x128xf32> to vector<4x128xf32>
    %165 = arith.truncf %160 : vector<4x32xf32> to vector<4x32xbf16>
    %cst_39 = arith.constant dense<0.000000e+00> : vector<4x128xf32>
    %166 = tpu.matmul %165, %7, %cst_39 {dimension_numbers = #tpu.dot_dimension_numbers<[1], [0], [0], [1], [0, 0, 1, 1], [], []>} : vector<4x32xbf16>, vector<32x128xbf16>, vector<4x128xf32> -> vector<4x128xf32>
    %167 = arith.addf %164, %166 : vector<4x128xf32>
    %168 = arith.negf %167 : vector<4x128xf32>
    %169 = math.exp %168 : vector<4x128xf32>
    %cst_40 = arith.constant 1.000000e+00 : f32
    %170 = vector.broadcast %cst_40 : f32 to vector<4x128xf32>
    %171 = arith.addf %170, %169 : vector<4x128xf32>
    %172 = arith.divf %170, %171 : vector<4x128xf32>
    %173 = math.tanh %167 : vector<4x128xf32>
    %174 = vector.extract_strided_slice %172 {offsets = [0, 0], sizes = [4, 32], strides = [1, 1]} : vector<4x128xf32> to vector<4x32xf32>
    %175 = vector.extract_strided_slice %172 {offsets = [0, 32], sizes = [4, 32], strides = [1, 1]} : vector<4x128xf32> to vector<4x32xf32>
    %176 = vector.extract_strided_slice %173 {offsets = [0, 64], sizes = [4, 32], strides = [1, 1]} : vector<4x128xf32> to vector<4x32xf32>
    %177 = vector.extract_strided_slice %172 {offsets = [0, 96], sizes = [4, 32], strides = [1, 1]} : vector<4x128xf32> to vector<4x32xf32>
    %178 = arith.mulf %175, %158 : vector<4x32xf32>
    %179 = arith.mulf %174, %176 : vector<4x32xf32>
    %180 = arith.addf %178, %179 : vector<4x32xf32>
    %181 = math.tanh %180 : vector<4x32xf32>
    %182 = arith.mulf %177, %181 : vector<4x32xf32>
    %c0_41 = arith.constant 0 : index
    %c28 = arith.constant 28 : index
    %c0_42 = arith.constant 0 : index
    %183 = vector.load %arg5[%c0_41, %c28, %c0_42] : memref<1x32x32xf32, #tpu.memory_space<vmem>>, vector<1x4x32xf32>
    %184 = vector.shape_cast %183 : vector<1x4x32xf32> to vector<4x32xf32>
    %185 = vector.shape_cast %182 : vector<4x32xf32> to vector<1x4x32xf32>
    tpu.vector_store %arg5[%c0_41, %c28, %c0_42], %185 {strides = array<i32>} : memref<1x32x32xf32, #tpu.memory_space<vmem>>, vector<1x4x32xf32>,
    return
  }
  func.func @transform_0(%arg0: i32) -> (i32, i32, i32) {
    %c0_i32 = arith.constant 0 : i32
    %c0_i32_0 = arith.constant 0 : i32
    %c0_i32_1 = arith.constant 0 : i32
    return %arg0, %c0_i32, %c0_i32_0 : i32, i32, i32
  }
  func.func @transform_1(%arg0: i32) -> (i32, i32) {
    %c0_i32 = arith.constant 0 : i32
    %c0_i32_0 = arith.constant 0 : i32
    %c0_i32_1 = arith.constant 0 : i32
    return %c0_i32, %c0_i32_0 : i32, i32
  }
  func.func @transform_2(%arg0: i32) -> (i32, i32) {
    %c0_i32 = arith.constant 0 : i32
    %c0_i32_0 = arith.constant 0 : i32
    %c0_i32_1 = arith.constant 0 : i32
    return %c0_i32, %c0_i32_0 : i32, i32
  }
  func.func @transform_3(%arg0: i32) -> (i32, i32) {
    %c0_i32 = arith.constant 0 : i32
    %c0_i32_0 = arith.constant 0 : i32
    %c0_i32_1 = arith.constant 0 : i32
    return %c0_i32, %c0_i32_0 : i32, i32
  }
  func.func @transform_4(%arg0: i32) -> (i32, i32, i32) {
    %c0_i32 = arith.constant 0 : i32
    %c0_i32_0 = arith.constant 0 : i32
    %c0_i32_1 = arith.constant 0 : i32
    return %arg0, %c0_i32, %c0_i32_0 : i32, i32, i32
  }
}

</mosaic_0001>

<bundles_post_ra>
// kernel: meta_lstm_forward_batched.1
= control target key start
LH: loop header
LB: loop body
LE: loop exit
PB: predicated region body
PF: predicated region fallthrough
CT: control target
= control target key end

     0   :  { %s1028_s15 = smov 0   ;;  %s1167_s0 = inlined_call_operand.vmem [shape: bf16[2,32,16], index: 0, kind: input, shape index: {}]   ;;  %s1168_s1 = inlined_call_operand.vmem [shape: bf16[16,128], index: 1, kind: input, shape index: {}]   ;;  %s1169_s2 = inlined_call_operand.vmem [shape: bf16[32,128], index: 2, kind: input, shape index: {}]   ;;  %s1170_s3 = inlined_call_operand.vmem [shape: f32[1,128], index: 3, kind: input, shape index: {}]   ;;  %s1171_s4 = inlined_call_operand.vmem [shape: f32[2,32,32], index: 4, kind: output, shape index: {}]  }
   0x1 LB: > { %s861_s16 = sadd.s32 4294967295, %s998_s15   ;;  %p865_p0 = scmp.ge.s32.totalorder %s998_s15, 1  ;;  %s998_s15 = sphi %s1028_s15, %s14_s15  }
   0x2   : > { %p162_p1 = scmp.lt.s32.totalorder %s998_s15, 3 }
   0x4   : > { %p163_p2 = pnand %p865_p0, %p162_p1 }
   0x5   : > { %p188_p3 = scmp.lt.s32.totalorder (!%p163_p2), %s861_s16, 1  ;;  %s1001_s29 = smov (!%p163_p2), 64  }
   0x6   : > { %166 = sbr.rel (%p163_p2) target bundleno = 4672 (0x1240), region = 36  ;;  %s1002_s30 = smov (!%p163_p2), 32  }
   0xb   : > { %v915_v0 = vld [vmem:[%s1169_s2 + $0x8] sm:$0xff]  ;;  %v913_v1 = vld [vmem:[%s1168_s1] sm:$0xff]  ;;  %s1173_s16 = smov (!%p188_p3, %s861_s16), 1  ;;  %vm225_vm0 = vcmask 130048   ;;  %v1000_v4 = vmov 0   ;;  %vm267_vm5 = vcmask 261120  }
   0xc   : > { %277 = vmatpush.bf16.msra.mxu1 %v915_v0  ;;  %239 = vmatpush.bf16.msra.mxu0 %v913_v1  ;;  %v914_v2 = vld [vmem:[%s1169_s2] sm:$0xff]  ;;  %s909_s23 = sshll.u32 %s1173_s16, 4  ;;  %s910_s5 = sshll.u32 %s1173_s16, 5 }
   0xd   : > { %341 = vmatpush.bf16.msra.mxu2 %v915_v0  ;;  %412 = vmatpush.bf16.msra.mxu3 %v915_v0  ;;  %s1051_s26 = scalar_lea.vmem %s1167_s0, %s909_s23  ;;  %v1058_v5 = vld [vmem:[%s1170_s3] ss:$0 sm:$0xff]  ;;  %s1136_s8 = scalar_lea.vmem %s1171_s4, %s910_s5 }
   0xe   : > { %v911_v3 = vld [vmem:[%s1051_s26] sm:$0xff] }
   0xf   : > { %882 = vmatmul.msk.bf16.vlgmr.msra.gmra.mxu0 %vm225_vm0, %v911_v3 }
  0x10   : > { %684 = vmatpush.bf16.msrb.mxu0 %v915_v0  ;;  %278 = vmatpush.bf16.msra.mxu1 %v914_v2 }
  0x11   : > { %342 = vmatpush.bf16.msra.mxu2 %v914_v2  ;;  %413 = vmatpush.bf16.msra.mxu3 %v914_v2 }
  0x13   : > { %279 = vmatmul.bf16.vlgmr.msra.gmra.mxu1 %v1000_v4 }
  0x14   : > { %478 = vmatpush.bf16.msrb.mxu1 %v915_v0  ;;  %685 = vmatpush.bf16.msrb.mxu0 %v914_v2 }
  0x15   : > { %548 = vmatpush.bf16.msrb.mxu2 %v915_v0  ;;  %614 = vmatpush.bf16.msrb.mxu3 %v915_v0 }
  0x18   : > { %479 = vmatpush.bf16.msrb.mxu1 %v914_v2 }
  0x19   : > { %549 = vmatpush.bf16.msrb.mxu2 %v914_v2  ;;  %615 = vmatpush.bf16.msrb.mxu3 %v914_v2 }
  0x1c   : > { %750 = vmatpush.bf16.msra.mxu1 %v915_v0 }
  0x20   : > { %751 = vmatpush.bf16.msra.mxu1 %v914_v2 }
  0x8c   : > { %v241_v6 = vpop.f32.mrf.mxu0 }
  0x8d   : > { %v242_v7 = vadd.f32 %v1058_v5, %v241_v6 }
  0x90   : > { %v280_v8 = vpop.f32.mrf.mxu1 }
  0x91   : > { %v284_v9 = vadd.f32 %v280_v8, %v242_v7 }
  0x93   : > { %928 = vtanh.f32 %v284_v9  ;;  %v892_v12 = vmul.f32 -1.442695, %v284_v9 }
  0x94   : > { %v243_v1 = vpop.f32.mrf.mxu0 }
  0x95   : > { %930 = vpow2.f32 %v892_v12  ;;  %v244_v2 = vadd.f32 %v1058_v5, %v243_v1 }
  0x98   : > { %v282_v10 = vpop.f32.mrf.mxu1 }
  0x99   : > { %v929_v11 = vpop.eup %928 }
  0x9a   : > { %307 = vrot.lane.b32.xlu0 %v929_v11, %s1001_s29 }
  0x9b   : > { %v931_v13 = vpop.eup %930 }
  0x9c   : > { %v288_v14 = vadd.f32 1.0, %v931_v13 }
  0x9e   : > { %932 = vrcp.f32 %v288_v14  ;;  %v300_v20 = vand.u32 2147483648, %v288_v14  ;;  %vm294_vm2 = vweird.f32 %v288_v14  ;;  %v298_v21 = vand.u32 2147483647, %v288_v14 }
  0xa0   : > { %v301_v23 = vor.u32 1.1754944e-38, %v300_v20  ;;  %vm299_vm4 = vcmp.eq.f32.partialorder %v298_v21, 8.507059e+37 }
  0xa4   : > { %v933_v15 = vpop.eup %932 }
  0xa5   : > { %v290_v16 = vmul.f32 %v933_v15, %v288_v14  ;;  %vm295_vm1 = vweird.f32 %v933_v15 }
  0xa6   : > { %vm296_vm3 = vmor %vm294_vm2, %vm295_vm1 }
  0xa7   : > { %v291_v17 = vsub.f32 1.0, %v290_v16 }
  0xa9   : > { %v292_v18 = vmul.f32 %v933_v15, %v291_v17 }
  0xab   : > { %v293_v19 = vadd.f32 %v933_v15, %v292_v18 }
  0xad   : > { %v297_v22 = vsel %vm296_vm3, %v933_v15, %v293_v19 }
  0xae   : > { %v302_v25 = vsel %vm299_vm4, %v301_v23, %v297_v22 }
  0xaf   : > { %v305_v27 = vmul.f32 0.0, %v302_v25 }
 0x10c   : > { %v308_v24 = vpop.permute.xlu0 %307 }
 0x10d   : > { %v310_v26 = vmul.f32 %v308_v24, %v302_v25 }
 0x10f   : > { %312 = vrot.lane.b32.xlu0 %v310_v26, %s1002_s30 }
 0x181   : > { %v313_v28 = vpop.permute.xlu0 %312 }
 0x182   : > { %v315_v29 = vadd.f32 %v313_v28, %v305_v27 }
 0x184   : > { %934 = vtanh.f32 %v315_v29  ;;  %v373_v55 = vrot.slane %v315_v29, 4 }
 0x18a   : > { %v935_v30 = vpop.eup %934 }
 0x18b   : > { %318 = vrot.lane.b32.xlu1 %v935_v30, %s1001_s29 }
 0x1fd   : > { %v319_v31 = vpop.permute.xlu1 %318 }
 0x1fe   : > { %v1064_v32 = vmul.f32 %v319_v31, %v302_v25 }
 0x200   : > { %v328_v33 = vpack.c.bf16 %v1064_v32, %v1064_v32 }
 0x202   : > { %330 = vrot.lane.b32.xlu1 %v328_v33, %s1002_s30 }
 0x274   : > { %v331_v34 = vpop.permute.xlu1 %330 }
 0x275   : > { %893 = vmatmul.msk.bf16.vlgmr.msra.gmra.mxu2 %vm267_vm5, %v331_v34 }
 0x2f8   : > { %v344_v35 = vpop.f32.mrf.mxu2 }
 0x2f9   : > { %v349_v36 = vrot.slane %v344_v35, 4 }
 0x2fb   : > { %v351_v37 = vadd.f32 %v349_v36, %v242_v7 }
 0x2fd   : > { %936 = vtanh.f32 %v351_v37  ;;  %v894_v40 = vmul.f32 -1.442695, %v351_v37 }
 0x2ff   : > { %938 = vpow2.f32 %v894_v40 }
 0x300   : > { %v346_v38 = vpop.f32.mrf.mxu2 }
 0x303   : > { %v937_v39 = vpop.eup %936 }
 0x304   : > { %377 = vrot.lane.b32.xlu2 %v937_v39, %s1001_s29 }
 0x305   : > { %v939_v41 = vpop.eup %938 }
 0x306   : > { %v355_v42 = vadd.f32 1.0, %v939_v41 }
 0x308   : > { %940 = vrcp.f32 %v355_v42  ;;  %v367_v48 = vand.u32 2147483648, %v355_v42  ;;  %vm361_vm7 = vweird.f32 %v355_v42  ;;  %v365_v49 = vand.u32 2147483647, %v355_v42 }
 0x30a   : > { %v368_v51 = vor.u32 1.1754944e-38, %v367_v48  ;;  %vm366_vm9 = vcmp.eq.f32.partialorder %v365_v49, 8.507059e+37 }
 0x30e   : > { %v941_v43 = vpop.eup %940 }
 0x30f   : > { %v357_v44 = vmul.f32 %v941_v43, %v355_v42  ;;  %vm362_vm6 = vweird.f32 %v941_v43 }
 0x310   : > { %vm363_vm8 = vmor %vm361_vm7, %vm362_vm6 }
 0x311   : > { %v358_v45 = vsub.f32 1.0, %v357_v44 }
 0x313   : > { %v359_v46 = vmul.f32 %v941_v43, %v358_v45 }
 0x315   : > { %v360_v47 = vadd.f32 %v941_v43, %v359_v46 }
 0x317   : > { %v364_v50 = vsel %vm363_vm8, %v941_v43, %v360_v47 }
 0x318   : > { %v369_v53 = vsel %vm366_vm9, %v368_v51, %v364_v50 }
 0x319   : > { %v375_v56 = vmul.f32 %v373_v55, %v369_v53 }
 0x35e   : > { %v378_v52 = vpop.permute.xlu2 %377 }
 0x35f   : > { %v380_v54 = vmul.f32 %v378_v52, %v369_v53 }
 0x361   : > { %382 = vrot.lane.b32.xlu2 %v380_v54, %s1002_s30 }
 0x3bb   : > { %v383_v57 = vpop.permute.xlu2 %382 }
 0x3bc   : > { %v385_v58 = vadd.f32 %v383_v57, %v375_v56 }
 0x3be   : > { %942 = vtanh.f32 %v385_v58  ;;  %v441_v23 = vrot.slane %v385_v58, 4  ;;  %v912_v58 = vld [vmem:[%s1051_s26 + $0x8] sm:$0xff] }
 0x3bf   : > { %883 = vmatmul.msk.bf16.gmra.mxu0 %vm225_vm0, %v912_v58 }
 0x3c4   : > { %v943_v59 = vpop.eup %942 }
 0x3c5   : > { %388 = vrot.lane.b32.xlu0 %v943_v59, %s1001_s29 }
 0x437   : > { %v389_v60 = vpop.permute.xlu0 %388 }
 0x438   : > { %v1073_v61 = vmul.f32 %v389_v60, %v369_v53 }
 0x43a   : > { %v398_v62 = vpack.c.bf16 %v1073_v61, %v1073_v61 }
 0x43c   : > { %v400_v63 = vrot.slane %v398_v62, 2  ;;  %v246_v1 = vpop.f32.mrf.mxu0 }
 0x43e   : > { %401 = vrot.lane.b32.xlu1 %v400_v63, %s1002_s30 }
 0x4b0   : > { %v402_v0 = vpop.permute.xlu1 %401 }
 0x4b1   : > { %895 = vmatmul.msk.bf16.vlgmr.msra.gmra.mxu3 %vm267_vm5, %v402_v0 }
 0x534   : > { %v415_v3 = vpop.f32.mrf.mxu3 }
 0x535   : > { %v419_v4 = vadd.f32 %v415_v3, %v244_v2 }
 0x537   : > { %944 = vtanh.f32 %v419_v4  ;;  %v896_v8 = vmul.f32 -1.442695, %v419_v4 }
 0x539   : > { %946 = vpow2.f32 %v896_v8 }
 0x53c   : > { %v417_v6 = vpop.f32.mrf.mxu3 }
 0x53d   : > { %v945_v7 = vpop.eup %944 }
 0x53e   : > { %445 = vrot.lane.b32.xlu2 %v945_v7, %s1001_s29 }
 0x53f   : > { %v947_v9 = vpop.eup %946 }
 0x540   : > { %v423_v10 = vadd.f32 1.0, %v947_v9 }
 0x542   : > { %948 = vrcp.f32 %v423_v10  ;;  %v435_v16 = vand.u32 2147483648, %v423_v10  ;;  %vm429_vm11 = vweird.f32 %v423_v10  ;;  %v433_v17 = vand.u32 2147483647, %v423_v10 }
 0x544   : > { %v436_v19 = vor.u32 1.1754944e-38, %v435_v16  ;;  %vm434_vm13 = vcmp.eq.f32.partialorder %v433_v17, 8.507059e+37 }
 0x548   : > { %v949_v11 = vpop.eup %948 }
 0x549   : > { %v425_v12 = vmul.f32 %v949_v11, %v423_v10  ;;  %vm430_vm10 = vweird.f32 %v949_v11 }
 0x54a   : > { %vm431_vm12 = vmor %vm429_vm11, %vm430_vm10 }
 0x54b   : > { %v426_v13 = vsub.f32 1.0, %v425_v12 }
 0x54d   : > { %v427_v14 = vmul.f32 %v949_v11, %v426_v13 }
 0x54f   : > { %v428_v15 = vadd.f32 %v949_v11, %v427_v14 }
 0x551   : > { %v432_v18 = vsel %vm431_vm12, %v949_v11, %v428_v15 }
 0x552   : > { %v437_v21 = vsel %vm434_vm13, %v436_v19, %v432_v18 }
 0x553   : > { %v443_v24 = vmul.f32 %v441_v23, %v437_v21 }
 0x598   : > { %v446_v20 = vpop.permute.xlu2 %445 }
 0x599   : > { %v448_v22 = vmul.f32 %v446_v20, %v437_v21 }
 0x59b   : > { %450 = vrot.lane.b32.xlu0 %v448_v22, %s1002_s30 }
 0x60d   : > { %v451_v25 = vpop.permute.xlu0 %450 }
 0x60e   : > { %v453_v26 = vadd.f32 %v451_v25, %v443_v24 }
 0x610   : > { %950 = vtanh.f32 %v453_v26  ;;  %v510_v53 = vrot.slane %v453_v26, 4 }
 0x616   : > { %v951_v27 = vpop.eup %950 }
 0x617   : > { %456 = vrot.lane.b32.xlu1 %v951_v27, %s1001_s29 }
 0x689   : > { %v457_v28 = vpop.permute.xlu1 %456 }
 0x68a   : > { %v1083_v29 = vmul.f32 %v457_v28, %v437_v21 }
 0x68c   : > { %v465_v30 = vpack.c.bf16 %v1083_v29, %v1083_v29 }
 0x68e   : > { %467 = vrot.lane.b32.xlu2 %v465_v30, %s1002_s30 }
 0x6e8   : > { %v468_v31 = vpop.permute.xlu2 %467 }
 0x6e9   : > { %897 = vmatmul.msk.bf16.vlgmr.msrb.gmra.mxu1 %vm267_vm5, %v468_v31 }
 0x766   : > { %v481_v33 = vpop.f32.mrf.mxu1 }
 0x767   : > { %v486_v34 = vrot.slane %v481_v33, 4 }
 0x769   : > { %v488_v35 = vadd.f32 %v486_v34, %v244_v2  ;;  %v247_v2 = vadd.f32 %v1058_v5, %v246_v1 }
 0x76b   : > { %952 = vtanh.f32 %v488_v35  ;;  %v898_v38 = vmul.f32 -1.442695, %v488_v35 }
 0x76d   : > { %954 = vpow2.f32 %v898_v38 }
 0x76e   : > { %v483_v36 = vpop.f32.mrf.mxu1 }
 0x771   : > { %v953_v37 = vpop.eup %952 }
 0x772   : > { %514 = vrot.lane.b32.xlu0 %v953_v37, %s1001_s29 }
 0x773   : > { %v955_v39 = vpop.eup %954 }
 0x774   : > { %v492_v40 = vadd.f32 1.0, %v955_v39 }
 0x776   : > { %956 = vrcp.f32 %v492_v40  ;;  %v504_v46 = vand.u32 2147483648, %v492_v40  ;;  %vm498_vm15 = vweird.f32 %v492_v40  ;;  %v502_v47 = vand.u32 2147483647, %v492_v40 }
 0x778   : > { %v505_v49 = vor.u32 1.1754944e-38, %v504_v46  ;;  %vm503_vm2 = vcmp.eq.f32.partialorder %v502_v47, 8.507059e+37 }
 0x77c   : > { %v957_v41 = vpop.eup %956 }
 0x77d   : > { %v494_v42 = vmul.f32 %v957_v41, %v492_v40  ;;  %vm499_vm14 = vweird.f32 %v957_v41 }
 0x77e   : > { %vm500_vm1 = vmor %vm498_vm15, %vm499_vm14 }
 0x77f   : > { %v495_v43 = vsub.f32 1.0, %v494_v42 }
 0x781   : > { %v496_v44 = vmul.f32 %v957_v41, %v495_v43 }
 0x783   : > { %v497_v45 = vadd.f32 %v957_v41, %v496_v44 }
 0x785   : > { %v501_v48 = vsel %vm500_vm1, %v957_v41, %v497_v45 }
 0x786   : > { %v506_v51 = vsel %vm503_vm2, %v505_v49, %v501_v48 }
 0x787   : > { %v512_v54 = vmul.f32 %v510_v53, %v506_v51 }
 0x7e4   : > { %v515_v50 = vpop.permute.xlu0 %514 }
 0x7e5   : > { %v517_v52 = vmul.f32 %v515_v50, %v506_v51 }
 0x7e7   : > { %519 = vrot.lane.b32.xlu1 %v517_v52, %s1002_s30 }
 0x859   : > { %v520_v55 = vpop.permute.xlu1 %519 }
 0x85a   : > { %v522_v56 = vadd.f32 %v520_v55, %v512_v54 }
 0x85c   : > { %958 = vtanh.f32 %v522_v56  ;;  %v577_v23 = vrot.slane %v522_v56, 4 }
 0x862   : > { %v959_v57 = vpop.eup %958 }
 0x863   : > { %525 = vrot.lane.b32.xlu2 %v959_v57, %s1001_s29 }
 0x8bd   : > { %v526_v59 = vpop.permute.xlu2 %525 }
 0x8be   : > { %v1094_v60 = vmul.f32 %v526_v59, %v506_v51 }
 0x8c0   : > { %v534_v62 = vpack.c.bf16 %v1094_v60, %v1094_v60 }
 0x8c2   : > { %v536_v63 = vrot.slane %v534_v62, 2 }
 0x8c4   : > { %537 = vrot.lane.b32.xlu0 %v536_v63, %s1002_s30 }
 0x936   : > { %v538_v0 = vpop.permute.xlu0 %537 }
 0x937   : > { %899 = vmatmul.msk.bf16.vlgmr.msrb.gmra.mxu2 %vm267_vm5, %v538_v0 }
 0x9ba   : > { %v551_v3 = vpop.f32.mrf.mxu2 }
 0x9bb   : > { %v555_v4 = vadd.f32 %v551_v3, %v247_v2 }
 0x9bd   : > { %960 = vtanh.f32 %v555_v4  ;;  %v900_v8 = vmul.f32 -1.442695, %v555_v4 }
 0x9bf   : > { %962 = vpow2.f32 %v900_v8 }
 0x9c2   : > { %v553_v6 = vpop.f32.mrf.mxu2 }
 0x9c3   : > { %v961_v7 = vpop.eup %960 }
 0x9c4   : > { %581 = vrot.lane.b32.xlu1 %v961_v7, %s1001_s29 }
 0x9c5   : > { %v963_v9 = vpop.eup %962 }
 0x9c6   : > { %v559_v10 = vadd.f32 1.0, %v963_v9 }
 0x9c8   : > { %964 = vrcp.f32 %v559_v10  ;;  %v571_v16 = vand.u32 2147483648, %v559_v10  ;;  %vm565_vm3 = vweird.f32 %v559_v10  ;;  %v569_v17 = vand.u32 2147483647, %v559_v10 }
 0x9ca   : > { %v572_v19 = vor.u32 1.1754944e-38, %v571_v16  ;;  %vm570_vm6 = vcmp.eq.f32.partialorder %v569_v17, 8.507059e+37 }
 0x9ce   : > { %v965_v11 = vpop.eup %964 }
 0x9cf   : > { %v561_v12 = vmul.f32 %v965_v11, %v559_v10  ;;  %vm566_vm0 = vweird.f32 %v965_v11 }
 0x9d0   : > { %vm567_vm4 = vmor %vm565_vm3, %vm566_vm0  ;;  %vm326_vm0 = vcmask 257024   ;;  %vm396_vm3 = vcmask 261124  }
 0x9d1   : > { %v562_v13 = vsub.f32 1.0, %v561_v12 }
 0x9d3   : > { %v563_v14 = vmul.f32 %v965_v11, %v562_v13 }
 0x9d5   : > { %v564_v15 = vadd.f32 %v965_v11, %v563_v14 }
 0x9d7   : > { %v568_v18 = vsel %vm567_vm4, %v965_v11, %v564_v15 }
 0x9d8   : > { %v573_v21 = vsel %vm570_vm6, %v572_v19, %v568_v18 }
 0x9d9   : > { %v579_v24 = vmul.f32 %v577_v23, %v573_v21 }
 0xa36   : > { %v582_v20 = vpop.permute.xlu1 %581 }
 0xa37   : > { %v584_v22 = vmul.f32 %v582_v20, %v573_v21 }
 0xa39   : > { %586 = vrot.lane.b32.xlu2 %v584_v22, %s1002_s30 }
 0xa93   : > { %v587_v25 = vpop.permute.xlu2 %586 }
 0xa94   : > { %v589_v26 = vadd.f32 %v587_v25, %v579_v24 }
 0xa96   : > { %966 = vtanh.f32 %v589_v26  ;;  %v646_v54 = vrot.slane %v589_v26, 4 }
 0xa9c   : > { %v967_v27 = vpop.eup %966 }
 0xa9d   : > { %592 = vrot.lane.b32.xlu0 %v967_v27, %s1001_s29 }
 0xb0f   : > { %v593_v28 = vpop.permute.xlu0 %592 }
 0xb10   : > { %v1104_v30 = vmul.f32 %v593_v28, %v573_v21 }
 0xb12   : > { %v601_v31 = vpack.c.bf16 %v1104_v30, %v1104_v30 }
 0xb14   : > { %603 = vrot.lane.b32.xlu1 %v601_v31, %s1002_s30 }
 0xb86   : > { %v604_v33 = vpop.permute.xlu1 %603 }
 0xb87   : > { %901 = vmatmul.msk.bf16.vlgmr.msrb.gmra.mxu3 %vm267_vm5, %v604_v33 }
 0xc0a   : > { %v617_v34 = vpop.f32.mrf.mxu3 }
 0xc0b   : > { %v622_v35 = vrot.slane %v617_v34, 4 }
 0xc0d   : > { %v624_v36 = vadd.f32 %v622_v35, %v247_v2  ;;  %v248_v2 = vpop.f32.mrf.mxu0 }
 0xc0e   : > { %v249_v3 = vadd.f32 %v1058_v5, %v248_v2 }
 0xc0f   : > { %968 = vtanh.f32 %v624_v36  ;;  %v902_v39 = vmul.f32 -1.442695, %v624_v36 }
 0xc11   : > { %970 = vpow2.f32 %v902_v39 }
 0xc12   : > { %v619_v37 = vpop.f32.mrf.mxu3 }
 0xc15   : > { %v969_v38 = vpop.eup %968 }
 0xc16   : > { %650 = vrot.lane.b32.xlu2 %v969_v38, %s1001_s29 }
 0xc17   : > { %v971_v40 = vpop.eup %970 }
 0xc18   : > { %v628_v41 = vadd.f32 1.0, %v971_v40 }
 0xc1a   : > { %972 = vrcp.f32 %v628_v41  ;;  %v640_v47 = vand.u32 2147483648, %v628_v41  ;;  %vm634_vm8 = vweird.f32 %v628_v41  ;;  %v638_v48 = vand.u32 2147483647, %v628_v41 }
 0xc1c   : > { %v641_v50 = vor.u32 1.1754944e-38, %v640_v47  ;;  %vm639_vm10 = vcmp.eq.f32.partialorder %v638_v48, 8.507059e+37 }
 0xc20   : > { %v973_v42 = vpop.eup %972 }
 0xc21   : > { %v630_v43 = vmul.f32 %v973_v42, %v628_v41  ;;  %vm635_vm7 = vweird.f32 %v973_v42 }
 0xc22   : > { %vm636_vm9 = vmor %vm634_vm8, %vm635_vm7 }
 0xc23   : > { %v631_v44 = vsub.f32 1.0, %v630_v43 }
 0xc25   : > { %v632_v45 = vmul.f32 %v973_v42, %v631_v44 }
 0xc27   : > { %v633_v46 = vadd.f32 %v973_v42, %v632_v45 }
 0xc29   : > { %v637_v49 = vsel %vm636_vm9, %v973_v42, %v633_v46 }
 0xc2a   : > { %v642_v52 = vsel %vm639_vm10, %v641_v50, %v637_v49 }
 0xc2b   : > { %v648_v55 = vmul.f32 %v646_v54, %v642_v52 }
 0xc70   : > { %v651_v51 = vpop.permute.xlu2 %650 }
 0xc71   : > { %v653_v53 = vmul.f32 %v651_v51, %v642_v52 }
 0xc73   : > { %655 = vrot.lane.b32.xlu0 %v653_v53, %s1002_s30 }
 0xce5   : > { %v656_v56 = vpop.permute.xlu0 %655 }
 0xce6   : > { %v658_v57 = vadd.f32 %v656_v56, %v648_v55 }
 0xce8   : > { %974 = vtanh.f32 %v658_v57  ;;  %v713_v23 = vrot.slane %v658_v57, 4 }
 0xcee   : > { %v975_v58 = vpop.eup %974 }
 0xcef   : > { %661 = vrot.lane.b32.xlu1 %v975_v58, %s1001_s29 }
 0xd61   : > { %v662_v59 = vpop.permute.xlu1 %661 }
 0xd62   : > { %v1113_v62 = vmul.f32 %v662_v59, %v642_v52 }
 0xd64   : > { %v670_v63 = vpack.c.bf16 %v1113_v62, %v1113_v62 }
 0xd66   : > { %v672_v0 = vrot.slane %v670_v63, 2 }
 0xd68   : > { %673 = vrot.lane.b32.xlu2 %v672_v0, %s1002_s30 }
 0xdc2   : > { %v674_v1 = vpop.permute.xlu2 %673 }
 0xdc3   : > { %903 = vmatmul.msk.bf16.vlgmr.msrb.gmra.mxu0 %vm267_vm5, %v674_v1 }
 0xe40   : > { %v687_v4 = vpop.f32.mrf.mxu0 }
 0xe41   : > { %v691_v6 = vadd.f32 %v687_v4, %v249_v3 }
 0xe43   : > { %976 = vtanh.f32 %v691_v6  ;;  %v904_v9 = vmul.f32 -1.442695, %v691_v6 }
 0xe45   : > { %978 = vpow2.f32 %v904_v9 }
 0xe48   : > { %v689_v7 = vpop.f32.mrf.mxu0 }
 0xe49   : > { %v977_v8 = vpop.eup %976 }
 0xe4a   : > { %717 = vrot.lane.b32.xlu0 %v977_v8, %s1001_s29 }
 0xe4b   : > { %v979_v10 = vpop.eup %978 }
 0xe4c   : > { %v695_v11 = vadd.f32 1.0, %v979_v10 }
 0xe4e   : > { %980 = vrcp.f32 %v695_v11  ;;  %v707_v17 = vand.u32 2147483648, %v695_v11  ;;  %vm701_vm12 = vweird.f32 %v695_v11  ;;  %v705_v5 = vand.u32 2147483647, %v695_v11 }
 0xe50   : > { %v708_v19 = vor.u32 1.1754944e-38, %v707_v17  ;;  %vm706_vm14 = vcmp.eq.f32.partialorder %v705_v5, 8.507059e+37 }
 0xe54   : > { %v981_v12 = vpop.eup %980 }
 0xe55   : > { %v697_v13 = vmul.f32 %v981_v12, %v695_v11  ;;  %vm702_vm11 = vweird.f32 %v981_v12 }
 0xe56   : > { %vm703_vm13 = vmor %vm701_vm12, %vm702_vm11 }
 0xe57   : > { %v698_v14 = vsub.f32 1.0, %v697_v13 }
 0xe59   : > { %v699_v15 = vmul.f32 %v981_v12, %v698_v14 }
 0xe5b   : > { %v700_v16 = vadd.f32 %v981_v12, %v699_v15 }
 0xe5d   : > { %v704_v18 = vsel %vm703_vm13, %v981_v12, %v700_v16 }
 0xe5e   : > { %v709_v21 = vsel %vm706_vm14, %v708_v19, %v704_v18 }
 0xe5f   : > { %v715_v24 = vmul.f32 %v713_v23, %v709_v21 }
 0xebc   : > { %v718_v20 = vpop.permute.xlu0 %717 }
 0xebd   : > { %v720_v22 = vmul.f32 %v718_v20, %v709_v21 }
 0xebf   : > { %722 = vrot.lane.b32.xlu1 %v720_v22, %s1002_s30 }
 0xf31   : > { %v723_v25 = vpop.permute.xlu1 %722 }
 0xf32   : > { %v725_v26 = vadd.f32 %v723_v25, %v715_v24 }
 0xf34   : > { %982 = vtanh.f32 %v725_v26  ;;  %v782_v56 = vrot.slane %v725_v26, 4 }
 0xf3a   : > { %v983_v27 = vpop.eup %982 }
 0xf3b   : > { %728 = vrot.lane.b32.xlu2 %v983_v27, %s1001_s29 }
 0xf95   : > { %v729_v28 = vpop.permute.xlu2 %728 }
 0xf96   : > { %v731_v31 = vmul.f32 %v729_v28, %v709_v21 }
 0xf98   : > { %v737_v33 = vpack.c.bf16 %v731_v31, %v731_v31 }
 0xf9a   : > { %739 = vrot.lane.b32.xlu0 %v737_v33, %s1002_s30 }
0x100c   : > { %v740_v34 = vpop.permute.xlu0 %739 }
0x100d   : > { %905 = vmatmul.msk.bf16.vlgmr.msra.gmra.mxu1 %vm267_vm5, %v740_v34 }
0x108a   : > { %v753_v35 = vpop.f32.mrf.mxu1 }
0x108b   : > { %v758_v36 = vrot.slane %v753_v35, 4 }
0x108d   : > { %v760_v37 = vadd.f32 %v758_v36, %v249_v3 }
0x108f   : > { %984 = vtanh.f32 %v760_v37  ;;  %v906_v40 = vmul.f32 -1.442695, %v760_v37 }
0x1091   : > { %986 = vpow2.f32 %v906_v40 }
0x1092   : > { %v755_v38 = vpop.f32.mrf.mxu1 }
0x1095   : > { %v985_v39 = vpop.eup %984 }
0x1096   : > { %786 = vrot.lane.b32.xlu1 %v985_v39, %s1001_s29 }
0x1097   : > { %v987_v41 = vpop.eup %986 }
0x1098   : > { %v764_v42 = vadd.f32 1.0, %v987_v41 }
0x109a   : > { %988 = vrcp.f32 %v764_v42  ;;  %v776_v48 = vand.u32 2147483648, %v764_v42  ;;  %vm770_vm15 = vweird.f32 %v764_v42 }
0x109e   : > { %323 = vrot.lane.b32.xlu1 %v1064_v32, %s1002_s30  ;;  %v774_v32 = vand.u32 2147483647, %v764_v42 }
0x10a0   : > { %v989_v43 = vpop.eup %988  ;;  %vm775_vm2 = vcmp.eq.f32.partialorder %v774_v32, 8.507059e+37 }
0x10a1   : > { %v766_v44 = vmul.f32 %v989_v43, %v764_v42  ;;  %vm771_vm5 = vweird.f32 %v989_v43 }
0x10a2   : > { %vm772_vm1 = vmor %vm770_vm15, %vm771_vm5 }
0x10a3   : > { %v767_v45 = vsub.f32 1.0, %v766_v44 }
0x10a5   : > { %v768_v46 = vmul.f32 %v989_v43, %v767_v45 }
0x10a6   : > { %530 = vrot.lane.b32.xlu1 %v1094_v60, %s1002_s30  ;;  %v777_v60 = vor.u32 1.1754944e-38, %v776_v48 }
0x10a7   : > { %v769_v47 = vadd.f32 %v989_v43, %v768_v46 }
0x10a9   : > { %v773_v49 = vsel %vm772_vm1, %v989_v43, %v769_v47 }
0x10aa   : > { %v778_v51 = vsel %vm775_vm2, %v777_v60, %v773_v49 }
0x10ab   : > { %v784_v57 = vmul.f32 %v782_v56, %v778_v51 }
0x10ae   : > { %733 = vrot.lane.b32.xlu1 %v731_v31, %s1002_s30 }
0x1108   : > { %v787_v50 = vpop.permute.xlu1 %786 }
0x1109   : > { %v789_v52 = vmul.f32 %v787_v50, %v778_v51 }
0x110b   : > { %791 = vrot.lane.b32.xlu2 %v789_v52, %s1002_s30 }
0x1110   : > { %v324_v53 = vpop.permute.xlu1 %323 }
0x1111   : > { %327 = vst.msk [vmem:[%s1136_s8] sm:$0xf] %vm326_vm0, %v324_v53 }
0x1113   : > { %393 = vrot.lane.b32.xlu2 %v1073_v61, %s1002_s30 }
0x1118   : > { %v531_v54 = vpop.permute.xlu1 %530 }
0x1119   : > { %533 = vst.msk [vmem:[%s1136_s8 + $0x8] sm:$0xf0] %vm396_vm3, %v531_v54 }
0x111b   : > { %597 = vrot.lane.b32.xlu2 %v1104_v30, %s1002_s30 }
0x1120   : > { %v734_v55 = vpop.permute.xlu1 %733 }
0x1121   : > { %736 = vst.msk [vmem:[%s1136_s8 + $0x18] sm:$0xf] %vm326_vm0, %v734_v55 }
0x1165   : > { %v792_v58 = vpop.permute.xlu2 %791 }
0x1166   : > { %v794_v59 = vadd.f32 %v792_v58, %v784_v57 }
0x1168   : > { %990 = vtanh.f32 %v794_v59 }
0x116d   : > { %v394_v63 = vpop.permute.xlu2 %393 }
0x116e   : > { %v991_v61 = vpop.eup %990  ;;  %397 = vst.msk [vmem:[%s1136_s8] sm:$0xf0] %vm396_vm3, %v394_v63 }
0x116f   : > { %797 = vrot.lane.b32.xlu0 %v991_v61, %s1001_s29 }
0x1175   : > { %v598_v0 = vpop.permute.xlu2 %597 }
0x1176   : > { %600 = vst.msk [vmem:[%s1136_s8 + $0x10] sm:$0xf] %vm326_vm0, %v598_v0 }
0x1177   : > { %461 = vrot.lane.b32.xlu0 %v1083_v29, %s1002_s30 }
0x117f   : > { %666 = vrot.lane.b32.xlu0 %v1113_v62, %s1002_s30 }
0x11e1   : > { %v798_v30 = vpop.permute.xlu0 %797 }
0x11e2   : > { %v800_v1 = vmul.f32 %v798_v30, %v778_v51 }
0x11e4   : > { %802 = vrot.lane.b32.xlu2 %v800_v1, %s1002_s30 }
0x11e9   : > { %v462_v2 = vpop.permute.xlu0 %461 }
0x11ea   : > { %464 = vst.msk [vmem:[%s1136_s8 + $0x8] sm:$0xf] %vm326_vm0, %v462_v2 }
0x11f1   : > { %v667_v3 = vpop.permute.xlu0 %666 }
0x11f2   : > { %669 = vst.msk [vmem:[%s1136_s8 + $0x10] sm:$0xf0] %vm396_vm3, %v667_v3 }
0x123e   : > { %v803_v4 = vpop.permute.xlu2 %802 }
0x123f   : > { %805 = vst.msk [vmem:[%s1136_s8 + $0x18] sm:$0xf0] %vm396_vm3, %v803_v4 }
0x1240 PF: > { %s14_s15 = sadd.s32 1, %s998_s15  }
0x1241   : > { %p11_p4 = scmp.ge.s32.totalorder %s14_s15, 4  }
0x1243   :  { %13 = sbr.rel (!%p11_p4) target bundleno = 1 (0x1), region = 66 }

</bundles_post_ra>
